<compile_context>
chip_gen: v7x
topology: tpu7x:2x2x1
jax: 0.10.0
libtpu: 0.0.40
codegen_flags: <defaults>
</compile_context>

<pallas_src>
import jax
import jax.numpy as jnp
from jax.experimental import pallas as pl
from jax.experimental.pallas import tpu as pltpu


def mlp_kernel(x_ref, w1t_ref, b1_ref, w2t_ref, b2_ref, out_ref):
    # x:   [Bp, Dp] (f32; cast to the MXU compute dtype here)
    # w1t: [Dp, Hp] (bf16)    b1: [Bp, Hp] (f32, or bf16 when bf16_elementwise)
    # w2t: [Hp, Cp] (bf16)    b2: [Bp, Cp] (f32)       out: [Bp, Cp] (f32)
    x = x_ref[...].astype(w1t_ref.dtype)

    # Layer 1: MXU matmul (bf16 in / f32 acc); bias-add + ReLU in b1's dtype
    # (f32 by default; bf16 on v6e/v7x when the elementwise option is enabled).
    h = jnp.dot(x, w1t_ref[...], preferred_element_type=jnp.float32)
    h = jnp.maximum(h.astype(b1_ref.dtype) + b1_ref[...], 0)

    # Layer 2: MXU matmul (bf16 in / f32 acc); bias-add in f32.
    out = jnp.dot(h.astype(w2t_ref.dtype), w2t_ref[...],
                  preferred_element_type=jnp.float32) + b2_ref[...]
    out_ref[...] = out


def _round_up(n, m):
    return ((n + m - 1) // m) * m


def make_forward(w1, b1, w2, b2, *, batch, compute_dtype=jnp.bfloat16,
                 bf16_elementwise=False):
    """One-time setup: pre-transpose/pad/cast params, return a jitted forward.

    w1: [H, D_in], b1: [H], w2: [C, H], b2: [C]   (PyTorch nn.Linear layout)
    bf16_elementwise: run bias-add/ReLU in bf16 (v6e/v7x only; keep False on
    v5e, which has no bf16 VALU).
    """
    H, D_in = w1.shape
    C = w2.shape[0]

    # Sublane pad to 16 for bf16 so LHS tiles are full packed [16,128] vregs.
    sublane = 16 if compute_dtype == jnp.bfloat16 else 8
    Bp = _round_up(batch, sublane)
    Dp = _round_up(D_in, 128)
    Hp = _round_up(H, 128)
    Cp = _round_up(C, 128)

    def pad2d(a, rows, cols):
        r, c = a.shape
        return jnp.pad(a, ((0, rows - r), (0, cols - c)))

    # Weights: transpose to [in, out], zero-pad lane-dense to 128 multiples,
    # cast to the MXU compute dtype.  Zero-padded w2t rows (hidden >= H)
    # guarantee the padded hidden lanes contribute nothing to the output.
    w1t_p = pad2d(w1.T, Dp, Hp).astype(compute_dtype)
    w2t_p = pad2d(w2.T, Hp, Cp).astype(compute_dtype)

    # Biases: zero-pad and pre-broadcast over the padded batch so the kernel
    # does a plain elementwise add (no in-kernel sublane broadcast).
    b1_dtype = compute_dtype if bf16_elementwise else jnp.float32
    b1_p = jnp.broadcast_to(pad2d(b1.reshape(1, -1), 1, Hp), (Bp, Hp)).astype(b1_dtype)
    b2_p = jnp.broadcast_to(pad2d(b2.reshape(1, -1), 1, Cp), (Bp, Cp)).astype(jnp.float32)

    # Materialize once; the per-call path never re-runs this preprocessing.
    w1t_p, w2t_p, b1_p, b2_p = jax.block_until_ready((w1t_p, w2t_p, b1_p, b2_p))

    wbytes = jnp.dtype(compute_dtype).itemsize
    cost = pl.CostEstimate(
        flops=2 * Bp * Dp * Hp + 2 * Bp * Hp * Cp,
        transcendentals=0,
        bytes_accessed=(Bp * Dp * 4                       # x (f32)
                        + Dp * Hp * wbytes                 # w1t
                        + Hp * Cp * wbytes                 # w2t
                        + b1_p.size * b1_p.dtype.itemsize  # b1
                        + Bp * Cp * 4                      # b2 (f32)
                        + Bp * Cp * 4),                    # out (f32)
    )

    vmem_spec = pl.BlockSpec(memory_space=pltpu.MemorySpace.VMEM)
    call = pl.pallas_call(
        mlp_kernel,
        out_shape=jax.ShapeDtypeStruct((Bp, Cp), jnp.float32),
        in_specs=[vmem_spec] * 5,
        out_specs=vmem_spec,
        cost_estimate=cost,
    )

    needs_pad = (batch, D_in) != (Bp, Dp)
    needs_slice = (Bp, Cp) != (batch, C)

    def forward(x):
        # x: [batch, D_in] f32.  Pad only if the static shape needs it; the
        # bf16 cast happens inside the kernel.  Padded batch rows carry
        # bias->ReLU->bias garbage until sliced off; never reduce over them.
        if needs_pad:
            x = jnp.pad(x, ((0, Bp - batch), (0, Dp - D_in)))
        out = call(x, w1t_p, b1_p, w2t_p, b2_p)
        if needs_slice:
            out = out[:batch, :C]
        return out

    return jax.jit(forward)


if __name__ == "__main__":
    # Module hyperparameters (small, consistent with the forward pass):
    input_size = 128
    num_classes = 10
    nNeuronsInFirstLayer = 72
    batch = 8

    key = jax.random.PRNGKey(0)
    k_x, k_w1, k_b1, k_w2, k_b2 = jax.random.split(key, 5)

    # PyTorch-style nn.Linear init: uniform(-1/sqrt(fan_in), 1/sqrt(fan_in)).
    bound1 = 1.0 / jnp.sqrt(jnp.float32(input_size))
    bound2 = 1.0 / jnp.sqrt(jnp.float32(nNeuronsInFirstLayer))

    w1 = jax.random.uniform(k_w1, (nNeuronsInFirstLayer, input_size),
                            jnp.float32, -bound1, bound1)
    b1 = jax.random.uniform(k_b1, (nNeuronsInFirstLayer,),
                            jnp.float32, -bound1, bound1)
    w2 = jax.random.uniform(k_w2, (num_classes, nNeuronsInFirstLayer),
                            jnp.float32, -bound2, bound2)
    b2 = jax.random.uniform(k_b2, (num_classes,),
                            jnp.float32, -bound2, bound2)

    x = jax.random.normal(k_x, (batch, input_size), jnp.float32)

    # One-time setup (all preprocessing hoisted here), then the cheap forward.
    forward = make_forward(w1, b1, w2, b2, batch=batch)
    out = jax.block_until_ready(forward(x))
    assert out.shape == (batch, num_classes)
    assert out.dtype == jnp.float32

    # Reference with matching bf16 operand precision / f32 accumulation.
    xb, w1b, w2b = (a.astype(jnp.bfloat16) for a in (x, w1, w2))
    h_ref = jnp.maximum(
        jnp.dot(xb, w1b.T, preferred_element_type=jnp.float32) + b1[None, :], 0.0)
    ref = jnp.dot(h_ref.astype(jnp.bfloat16), w2b.T,
                  preferred_element_type=jnp.float32) + b2[None, :]
    assert jnp.allclose(out, ref, atol=1e-2, rtol=1e-2)

    # Sanity check against the full-f32 semantics of the original module.
    # NOTE: bf16 MXU operands => results differ from pure f32 at the ~1e-2 level.
    ref_f32 = jnp.maximum(x @ w1.T + b1[None, :], 0.0) @ w2.T + b2[None, :]
    assert jnp.allclose(out, ref_f32, atol=5e-2, rtol=5e-2)

    print("KERNEL_OK")
</pallas_src>

<mosaic_0001>
module attributes {stable_mosaic.version = 11 : i64} {
  func.func @mlp_kernel(%arg0: memref<16x128xf32, #tpu.memory_space<vmem>>, %arg1: memref<128x128xbf16, #tpu.memory_space<vmem>>, %arg2: memref<16x128xf32, #tpu.memory_space<vmem>>, %arg3: memref<128x128xbf16, #tpu.memory_space<vmem>>, %arg4: memref<16x128xf32, #tpu.memory_space<vmem>>, %arg5: memref<16x128xf32, #tpu.memory_space<vmem>>) attributes {dimension_semantics = [], scalar_prefetch = 0 : i64, scratch_operands = 0 : i64, tpu.core_type = #tpu.core_type<tc>} {
    %c0 = arith.constant 0 : index
    %c0_0 = arith.constant 0 : index
    %0 = vector.load %arg0[%c0, %c0_0] : memref<16x128xf32, #tpu.memory_space<vmem>>, vector<16x128xf32>
    %1 = arith.truncf %0 : vector<16x128xf32> to vector<16x128xbf16>
    %c0_1 = arith.constant 0 : index
    %c0_2 = arith.constant 0 : index
    %2 = vector.load %arg1[%c0_1, %c0_2] : memref<128x128xbf16, #tpu.memory_space<vmem>>, vector<128x128xbf16>
    %cst = arith.constant dense<0.000000e+00> : vector<16x128xf32>
    %3 = tpu.matmul %1, %2, %cst {dimension_numbers = #tpu.dot_dimension_numbers<[1], [0], [0], [1], [0, 0, 1, 1], [], []>} : vector<16x128xbf16>, vector<128x128xbf16>, vector<16x128xf32> -> vector<16x128xf32>
    %c0_3 = arith.constant 0 : index
    %c0_4 = arith.constant 0 : index
    %4 = vector.load %arg2[%c0_3, %c0_4] : memref<16x128xf32, #tpu.memory_space<vmem>>, vector<16x128xf32>
    %5 = arith.addf %3, %4 : vector<16x128xf32>
    %cst_5 = arith.constant 0.000000e+00 : f32
    %6 = vector.broadcast %cst_5 : f32 to vector<16x128xf32>
    %7 = arith.maximumf %5, %6 : vector<16x128xf32>
    %8 = arith.truncf %7 : vector<16x128xf32> to vector<16x128xbf16>
    %c0_6 = arith.constant 0 : index
    %c0_7 = arith.constant 0 : index
    %9 = vector.load %arg3[%c0_6, %c0_7] : memref<128x128xbf16, #tpu.memory_space<vmem>>, vector<128x128xbf16>
    %cst_8 = arith.constant dense<0.000000e+00> : vector<16x128xf32>
    %10 = tpu.matmul %8, %9, %cst_8 {dimension_numbers = #tpu.dot_dimension_numbers<[1], [0], [0], [1], [0, 0, 1, 1], [], []>} : vector<16x128xbf16>, vector<128x128xbf16>, vector<16x128xf32> -> vector<16x128xf32>
    %c0_9 = arith.constant 0 : index
    %c0_10 = arith.constant 0 : index
    %11 = vector.load %arg4[%c0_9, %c0_10] : memref<16x128xf32, #tpu.memory_space<vmem>>, vector<16x128xf32>
    %12 = arith.addf %10, %11 : vector<16x128xf32>
    %c0_11 = arith.constant 0 : index
    %c0_12 = arith.constant 0 : index
    %13 = vector.load %arg5[%c0_11, %c0_12] : memref<16x128xf32, #tpu.memory_space<vmem>>, vector<16x128xf32>
    tpu.vector_store %arg5[%c0_11, %c0_12], %12 {strides = array<i32>} : memref<16x128xf32, #tpu.memory_space<vmem>>, vector<16x128xf32>,
    return
  }
}

</mosaic_0001>

<bundles_post_ra>
// kernel: forward.1
= control target key start
LH: loop header
LB: loop body
LE: loop exit
PB: predicated region body
PF: predicated region fallthrough
CT: control target
= control target key end

     0   :  { %10 = vsyncpa [#allocation3], 0  ;;  %s505_s0 = inlined_call_operand.vmem [shape: f32[16,128], index: 0, kind: input, shape index: {}]   ;;  %s506_s1 = inlined_call_operand.hbm [shape: bf16[128,128], index: 1, kind: input, shape index: {}]   ;;  %s507_s2 = inlined_call_operand.vmem [shape: f32[16,128], index: 2, kind: input, shape index: {}]   ;;  %s508_s3 = inlined_call_operand.hbm [shape: bf16[128,128], index: 3, kind: input, shape index: {}]   ;;  %s509_s4 = inlined_call_operand.vmem [shape: f32[16,128], index: 4, kind: input, shape index: {}]   ;;  %s510_s5 = inlined_call_operand.vmem [shape: f32[16,128], index: 5, kind: output, shape index: {}]  }
   0x1   :  { %11 = vsyncpa [#allocation5], 0  ;;  %s421_s18 = smov [#allocation2]   ;;  %s373_s22 = scalar_lea.hbm %s506_s1, 1024 }
   0x2   :  { %s19_s19 = sshll.u32 %s421_s18, 4  ;;  %p374_p0 = scmp.ne.s32.totalorder %s506_s1, %s373_s22  ;;  %s20_s19 = int_to_ptr.vmem [resolvable:$true] %s19_s19 }
   0x3   :  { %p377_p1 = scmp.lt.u32.totalorder %s373_s22, %s506_s1 }
   0x5   :  { %p379_p2 = pnand %p377_p1, %p374_p0 }
   0x7   :  { %382 = shalt.err (!%p379_p2)
}
   0x8   :  { %s383_s27 = scalar_lea.vmem %s20_s19, 1024  ;;  %p388_p4 = scmp.lt.s32.totalorder %s20_s19, %s20_s19 }
   0x9   :  { %p384_p3 = scmp.ne.s32.totalorder %s20_s19, %s383_s27  ;;  %p389_p5 = scmp.lt.s32.totalorder %s383_s27, %s383_s27 }
   0xb   :  { %p390_p6 = por %p389_p5, %p388_p4 }
   0xd   :  { %p391_p7 = pnand %p390_p6, %p384_p3 }
   0xf   :  { %394 = shalt.err (!%p391_p7)
}
  0x10   :  { %s422_s28 = smov 64   ;;  %s423_s29 = smov 4  }
  0x11   :  { %25 = dma.hbm_to_vmem [thread:$0]  %s506_s1, 1024, %s20_s19, [#allocation3], %s422_s28, %s422_s28, %s423_s29  }
  0x12   :  { %s424_s7 = smov [#allocation4]   ;;  %s395_s11 = scalar_lea.hbm %s508_s3, 1024 }
  0x13   :  { %s33_s8 = sshll.u32 %s424_s7, 4  ;;  %p396_p8 = scmp.ne.s32.totalorder %s508_s3, %s395_s11  ;;  %s34_s8 = int_to_ptr.vmem [resolvable:$true] %s33_s8 }
  0x14   :  { %p399_p9 = scmp.lt.u32.totalorder %s395_s11, %s508_s3 }
  0x16   :  { %p401_p10 = pnand %p399_p9, %p396_p8 }
  0x18   :  { %404 = shalt.err (!%p401_p10)
}
  0x19   :  { %s405_s16 = scalar_lea.vmem %s34_s8, 1024  ;;  %p410_p12 = scmp.lt.s32.totalorder %s34_s8, %s34_s8 }
  0x1a   :  { %p406_p11 = scmp.ne.s32.totalorder %s34_s8, %s405_s16  ;;  %p411_p13 = scmp.lt.s32.totalorder %s405_s16, %s405_s16 }
  0x1c   :  { %p412_p0 = por %p411_p13, %p410_p12 }
  0x1e   :  { %p413_p1 = pnand %p412_p0, %p406_p11 }
  0x20   :  { %416 = shalt.err (!%p413_p1)
}
  0x21   :  { %39 = dma.hbm_to_vmem [thread:$0]  %s508_s3, 1024, %s34_s8, [#allocation5], %s422_s28, %s422_s28, %s423_s29  }
  0x22   :  { %417 = dma.done.wait [#allocation3], 1024  }
  0x23   :  { %418 = vsyncadd [#allocation3], 4294966272 }
  0x24   :  { %419 = dma.done.wait [#allocation5], 1024  }
  0x25   :  { %420 = vsyncadd [#allocation5], 4294966272  ;;  %v425_v0 = vmov 0.0   ;;  %vm426_vm0 = vmmov 0   ;;  %v357_v1 = vld [vmem:[#allocation2] sm:$0xff]   ;;  %v358_v2 = vld [vmem:[#allocation2 + $0x8] sm:$0xff]  }
  0x26   :  { %311 = vmatprep.subr.bf16.mxu0 %v425_v0  ;;  %327 = vmatprep.mubr.msk.bf16.mxu0 %vm426_vm0, %v425_v0  ;;  %v359_v3 = vld [vmem:[#allocation2 + $0x10] sm:$0xff]   ;;  %v365_v4 = vld [vmem:[#allocation4] sm:$0xff]   ;;  %v360_v5 = vld [vmem:[#allocation2 + $0x18] sm:$0xff]  }
  0x27   :  { %331 = vmatprep.subr.bf16.mxu1 %v425_v0  ;;  %347 = vmatprep.mubr.msk.bf16.mxu1 %vm426_vm0, %v425_v0  ;;  %v366_v6 = vld [vmem:[#allocation4 + $0x8] sm:$0xff]   ;;  %v361_v7 = vld [vmem:[#allocation2 + $0x20] sm:$0xff]   ;;  %v367_v8 = vld [vmem:[#allocation4 + $0x10] sm:$0xff]  }
  0x28   :  { %312 = vmatpush3.bf16.msra.mxu0 %v357_v1  ;;  %332 = vmatpush3.bf16.msra.mxu1 %v365_v4  ;;  %v362_v9 = vld [vmem:[#allocation2 + $0x28] sm:$0xff]   ;;  %v368_v10 = vld [vmem:[#allocation4 + $0x18] sm:$0xff]   ;;  %v363_v11 = vld [vmem:[#allocation2 + $0x30] sm:$0xff]  }
  0x29   :  { %313 = vmatprep.subr.bf16.mxu0 %v425_v0  ;;  %333 = vmatprep.subr.bf16.mxu1 %v425_v0  ;;  %v369_v12 = vld [vmem:[#allocation4 + $0x20] sm:$0xff]   ;;  %v364_v13 = vld [vmem:[#allocation2 + $0x38] sm:$0xff]   ;;  %v50_v15 = vld [vmem:[%s505_s0 + $0x8] sm:$0xff] }
  0x2a   :  { %v49_v14 = vld [vmem:[%s505_s0] sm:$0xff]  ;;  %v370_v16 = vld [vmem:[#allocation4 + $0x28] sm:$0xff]   ;;  %v371_v18 = vld [vmem:[#allocation4 + $0x30] sm:$0xff]  }
  0x2b   :  { %v51_v17 = vpack.c.bf16 %v50_v15, %v49_v14  ;;  %v372_v19 = vld [vmem:[#allocation4 + $0x38] sm:$0xff]   ;;  %v68_v20 = vld [vmem:[%s507_s2] sm:$0xff]  ;;  %v69_v22 = vld [vmem:[%s507_s2 + $0x8] sm:$0xff] }
  0x2c   :  { %314 = vmatpush3.bf16.msra.mxu0 %v358_v2  ;;  %334 = vmatpush3.bf16.msra.mxu1 %v366_v6  ;;  %v178_v31 = vld [vmem:[%s509_s4] sm:$0xff]  ;;  %v179_v33 = vld [vmem:[%s509_s4 + $0x8] sm:$0xff] }
  0x2d   :  { %315 = vmatprep.subr.bf16.mxu0 %v425_v0  ;;  %335 = vmatprep.subr.bf16.mxu1 %v425_v0 }
  0x30   :  { %316 = vmatpush3.bf16.msra.mxu0 %v359_v3  ;;  %336 = vmatpush3.bf16.msra.mxu1 %v367_v8 }
  0x31   :  { %317 = vmatprep.subr.bf16.mxu0 %v425_v0  ;;  %337 = vmatprep.subr.bf16.mxu1 %v425_v0 }
  0x34   :  { %318 = vmatpush3.bf16.msra.mxu0 %v360_v5  ;;  %338 = vmatpush3.bf16.msra.mxu1 %v368_v10 }
  0x35   :  { %319 = vmatprep.subr.bf16.mxu0 %v425_v0  ;;  %339 = vmatprep.subr.bf16.mxu1 %v425_v0 }
  0x38   :  { %320 = vmatpush3.bf16.msra.mxu0 %v361_v7  ;;  %340 = vmatpush3.bf16.msra.mxu1 %v369_v12 }
  0x39   :  { %321 = vmatprep.subr.bf16.mxu0 %v425_v0  ;;  %341 = vmatprep.subr.bf16.mxu1 %v425_v0 }
  0x3c   :  { %322 = vmatpush3.bf16.msra.mxu0 %v362_v9  ;;  %342 = vmatpush3.bf16.msra.mxu1 %v370_v16 }
  0x3d   :  { %323 = vmatprep.subr.bf16.mxu0 %v425_v0  ;;  %343 = vmatprep.subr.bf16.mxu1 %v425_v0 }
  0x40   :  { %324 = vmatpush3.bf16.msra.mxu0 %v363_v11  ;;  %344 = vmatpush3.bf16.msra.mxu1 %v371_v18 }
  0x41   :  { %325 = vmatprep.subr.bf16.mxu0 %v425_v0  ;;  %345 = vmatprep.subr.bf16.mxu1 %v425_v0 }
  0x44   :  { %326 = vmatpush3.bf16.msra.mxu0 %v364_v13  ;;  %346 = vmatpush3.bf16.msra.mxu1 %v372_v19 }
  0x47   :  { %328 = vmatmul.mubr.bf16.vlgmr.msra.gmra.mrb[0].mxu0 %v51_v17 }
 0x11a   :  { %v152_v21 = vpop.f32.mrb[0].mxu0 }
 0x11b   :  { %v153_v23 = vadd.f32 %v152_v21, %v68_v20  ;;  %v329_v24 = vpop.f32.mrb[1].mxu0 }
 0x11c   :  { %v155_v25 = vpop.f32.mrb[2].mxu0 }
 0x11d   :  { %v156_v26 = vadd.f32 %v155_v25, %v69_v22  ;;  %v330_v27 = vpop.f32.mrb[3].mxu0  ;;  %v159_v28 = vmax.f32 %v153_v23, 0.0 }
 0x11f   :  { %v160_v29 = vmax.f32 %v156_v26, 0.0 }
 0x121   :  { %v161_v30 = vpack.c.bf16 %v160_v29, %v159_v28 }
 0x123   :  { %348 = vmatmul.mubr.bf16.vlgmr.msra.gmra.mrb[0].mxu1 %v161_v30 }
 0x1f6   :  { %v262_v32 = vpop.f32.mrb[0].mxu1 }
 0x1f7   :  { %v263_v34 = vadd.f32 %v262_v32, %v178_v31  ;;  %v349_v35 = vpop.f32.mrb[1].mxu1 }
 0x1f8   :  { %v265_v36 = vpop.f32.mrb[2].mxu1 }
 0x1f9   :  { %269 = vst [vmem:[%s510_s5] sm:$0xff] %v263_v34  ;;  %v266_v37 = vadd.f32 %v265_v36, %v179_v33  ;;  %v350_v38 = vpop.f32.mrb[3].mxu1 }
 0x1fb   :  { %270 = vst [vmem:[%s510_s5 + $0x8] sm:$0xff] %v266_v37 }
 0x1fc   :  { %275 = vsyncpa [#allocation3], 1 }
 0x1fd   :  { %276 = vsyncpa [#allocation5], 1 }

</bundles_post_ra>
